<compile_context>
chip_gen: v7x
topology: tpu7x:2x2x1
jax: 0.10.0
libtpu: 0.0.40
codegen_flags: <defaults>
</compile_context>

<pallas_src>
import jax
import jax.numpy as jnp
from jax import lax
from jax.experimental import pallas as pl
from jax.experimental.pallas import tpu as pltpu

# ----- model configuration (small, consistent with the module) -----
VOCAB = 16
EMBEDDING_DIM = 32
HIDDEN_SIZE_LSTM = 32          # H ; 4H = 128 = one lane tile
HIDDEN_SIZE_SENT = 16
HIDDEN_SIZE_LANG = 16
OUTPUT_SIZE = 1
NUM_LANG = 3
LAMBDA = 0.5                   # forward-pass no-op (gradient-reversal scale)

H = HIDDEN_SIZE_LSTM
G = 4 * H                      # 128 gate lanes
SLAB_ROWS = 72                 # w_hh(32) | W_head(32) | b_head row @64 | pad to 72


def lisa_kernel(pre_ref, len_ref, slab_ref, out_ref):
    """pre_ref:  (S, Bp, 4H) per-token gate pre-activations (x@W_ih + b), g-cols x2.
    len_ref:  (Bp, 128) int32, each row filled with that sequence's length.
    slab_ref: (72, 128) packed weights: rows 0..31 w_hh (g-cols x2),
              rows 32..63 fused head W_head, row 64 fused head bias.
    out_ref:  (Bp, 128) lane-dense output; col 0 = sentiment, cols 1..3 = language.
    """
    S = pre_ref.shape[0]
    Bp = pre_ref.shape[1]

    w_hh = slab_ref[0:H, :]                     # (H, 4H) recurrent weights (g-cols pre-scaled)
    w_head = slab_ref[H:2 * H, :]               # (H, 128) fused sentiment|language head
    b_head = slab_ref[2 * H:2 * H + 1, :]       # (1, 128) fused head bias
    lens_h = len_ref[:, 0:H]                    # (Bp, H) hoisted once; no per-step broadcast

    def step(t, carry):
        h, c = carry                            # (Bp, H) each
        # only the recurrent matmul remains on the serial critical path
        gates = pre_ref[t] + jnp.dot(h, w_hh, preferred_element_type=jnp.float32)  # (Bp, 4H)
        # single EUP pass over the whole 128-lane gate vreg; the g gate uses
        # tanh(x) = 2*sigmoid(2x) - 1 (its pre-activation columns were doubled
        # in the wrapper), so no second full-vreg transcendental is needed.
        sig = jax.nn.sigmoid(gates)
        i_g = sig[:, 0 * H:1 * H]               # PyTorch gate order i, f, g, o
        f_g = sig[:, 1 * H:2 * H]
        g_g = 2.0 * sig[:, 2 * H:3 * H] - 1.0   # == tanh(g_preact)
        o_g = sig[:, 3 * H:4 * H]
        c_new = f_g * c + i_g * g_g
        h_new = o_g * jnp.tanh(c_new)
        valid = t < lens_h                      # (Bp, H) packed-seq mask (keeps last valid state)
        h = jnp.where(valid, h_new, h)
        c = jnp.where(valid, c_new, c)
        return (h, c)

    h0 = jnp.zeros((Bp, H), jnp.float32)
    c0 = jnp.zeros((Bp, H), jnp.float32)
    h, _ = lax.fori_loop(0, S, step, (h0, c0), unroll=True)

    # ---- fused heads: LeakyReLU(True)==identity, Dropout(eval), ReverseGrad fwd
    # all identity, so both 2-layer heads collapse to a single affine map.
    out_ref[...] = jnp.dot(h, w_head, preferred_element_type=jnp.float32) + b_head


def init_params(key):
    ks = jax.random.split(key, 13)
    s = 0.1
    emb = jax.random.normal(ks[0], (VOCAB, EMBEDDING_DIM), jnp.float32) * s
    emb = emb.at[0].set(0.0)  # padding_idx=0
    p = dict(
        emb=emb,
        w_ih=jax.random.normal(ks[1], (EMBEDDING_DIM, 4 * H), jnp.float32) * s,
        w_hh=jax.random.normal(ks[2], (H, 4 * H), jnp.float32) * s,
        b=jax.random.normal(ks[3], (1, 4 * H), jnp.float32) * s,       # bias_ih + bias_hh
        ws1=jax.random.normal(ks[4], (H, HIDDEN_SIZE_SENT), jnp.float32) * s,
        bs1=jax.random.normal(ks[5], (1, HIDDEN_SIZE_SENT), jnp.float32) * s,
        ws2=jax.random.normal(ks[6], (HIDDEN_SIZE_SENT, OUTPUT_SIZE), jnp.float32) * s,
        bs2=jax.random.normal(ks[7], (1, OUTPUT_SIZE), jnp.float32) * s,
        wl1=jax.random.normal(ks[8], (H, HIDDEN_SIZE_LANG), jnp.float32) * s,
        bl1=jax.random.normal(ks[9], (1, HIDDEN_SIZE_LANG), jnp.float32) * s,
        wl2=jax.random.normal(ks[10], (HIDDEN_SIZE_LANG, NUM_LANG), jnp.float32) * s,
        bl2=jax.random.normal(ks[11], (1, NUM_LANG), jnp.float32) * s,
    )
    return p


def prepare_params(params):
    """Param-only precompute. Call ONCE (outside the per-example forward path).

    Returns:
      gate_table: (VOCAB, 4H) f32  -- emb @ W_ih + bias, g-gate columns x2.
      slab:       (72, 128) f32    -- [w_hh (g-cols x2) | fused head W | fused head b].
    """
    gate_table = params["emb"] @ params["w_ih"] + params["b"]            # (VOCAB, 4H)
    gate_table = gate_table.at[:, 2 * H:3 * H].multiply(2.0)             # tanh(g)=2*sig(2g)-1

    w_hh = params["w_hh"].at[:, 2 * H:3 * H].multiply(2.0)               # match g scaling

    # Fused heads: LeakyReLU(slope=1)/Dropout(eval)/ReverseGrad(fwd) are identity,
    # so (h@ws1+bs1)@ws2+bs2 == h@(ws1@ws2) + (bs1@ws2+bs2); same for language.
    w_head = jnp.zeros((H, 128), jnp.float32)
    w_head = w_head.at[:, 0:OUTPUT_SIZE].set(params["ws1"] @ params["ws2"])
    w_head = w_head.at[:, OUTPUT_SIZE:OUTPUT_SIZE + NUM_LANG].set(params["wl1"] @ params["wl2"])

    b_head = jnp.zeros((1, 128), jnp.float32)
    b_head = b_head.at[:, 0:OUTPUT_SIZE].set(params["bs1"] @ params["ws2"] + params["bs2"])
    b_head = b_head.at[:, OUTPUT_SIZE:OUTPUT_SIZE + NUM_LANG].set(
        params["bl1"] @ params["wl2"] + params["bl2"])

    slab = jnp.zeros((SLAB_ROWS, 128), jnp.float32)
    slab = slab.at[0:H, :].set(w_hh)                    # rows 0..31
    slab = slab.at[H:2 * H, :].set(w_head)              # rows 32..63
    slab = slab.at[2 * H:2 * H + 1, :].set(b_head)      # row 64
    return gate_table, slab


@jax.jit
def lisa_forward(x_tokens, x_lengths, gate_table, slab):
    B, S = x_tokens.shape
    Bp = max(8, ((B + 7) // 8) * 8)                     # pad batch to the f32 sublane count

    # Time-major gather: transpose/pad the tiny int32 token matrix (not the f32
    # activations); jnp.take then emits (S, Bp, 4H) directly.
    tok_t = jnp.pad(jnp.transpose(x_tokens).astype(jnp.int32), ((0, 0), (0, Bp - B)))
    pre = jnp.take(gate_table, tok_t, axis=0)           # (S, Bp, 4H)

    lens = jnp.pad(x_lengths.astype(jnp.int32), (0, Bp - B))
    lens2d = jnp.broadcast_to(lens[:, None], (Bp, 128)) # lane-dense; avoids (Bp,1) partial loads

    vmem = pl.BlockSpec(memory_space=pltpu.MemorySpace.VMEM)
    out = pl.pallas_call(
        lisa_kernel,
        out_shape=jax.ShapeDtypeStruct((Bp, 128), jnp.float32),
        in_specs=[vmem, vmem, vmem],
        out_specs=vmem,
    )(pre, lens2d, slab)

    sent = out[:B, 0:OUTPUT_SIZE]
    lang = out[:B, OUTPUT_SIZE:OUTPUT_SIZE + NUM_LANG]
    return sent, lang


def lisa_reference(x_tokens, x_lengths, params):
    """Pure-JAX reference mirroring the PyTorch forward (no folding/fusion)."""
    embedded = jnp.take(params["emb"], x_tokens, axis=0)             # (B, S, E)
    B, S, _ = embedded.shape
    lens = x_lengths.astype(jnp.int32).reshape(B, 1)

    def step(carry, t):
        h, c = carry
        x_t = embedded[:, t, :]
        gates = x_t @ params["w_ih"] + h @ params["w_hh"] + params["b"]
        i_g = jax.nn.sigmoid(gates[:, 0 * H:1 * H])
        f_g = jax.nn.sigmoid(gates[:, 1 * H:2 * H])
        g_g = jnp.tanh(gates[:, 2 * H:3 * H])
        o_g = jax.nn.sigmoid(gates[:, 3 * H:4 * H])
        c_new = f_g * c + i_g * g_g
        h_new = o_g * jnp.tanh(c_new)
        valid = t < lens
        return (jnp.where(valid, h_new, h), jnp.where(valid, c_new, c)), None

    (h, _), _ = lax.scan(step, (jnp.zeros((B, H)), jnp.zeros((B, H))), jnp.arange(S))
    fc1 = h @ params["ws1"] + params["bs1"]
    fc1 = jnp.where(fc1 >= 0, fc1, 1.0 * fc1)    # LeakyReLU(True) == identity
    sent = fc1 @ params["ws2"] + params["bs2"]
    l1 = h @ params["wl1"] + params["bl1"]
    lang = l1 @ params["wl2"] + params["bl2"]
    return sent, lang


if __name__ == "__main__":
    key = jax.random.PRNGKey(0)
    k_tok, k_par = jax.random.split(key)

    B, S = 4, 8
    x_lengths = jnp.array([8, 6, 4, 2], dtype=jnp.int32)             # sorted decreasing
    x_tokens = jax.random.randint(k_tok, (B, S), 1, VOCAB, dtype=jnp.int32)
    # zero-pad past each sequence's length (padding_idx = 0)
    pad_mask = jnp.arange(S)[None, :] < x_lengths[:, None]
    x_tokens = jnp.where(pad_mask, x_tokens, 0)

    params = init_params(k_par)
    gate_table, slab = prepare_params(params)        # param-only; computed once

    sent, lang = lisa_forward(x_tokens, x_lengths, gate_table, slab)
    sent, lang = jax.block_until_ready((sent, lang))

    sent_ref, lang_ref = lisa_reference(x_tokens, x_lengths, params)
    assert sent.shape == (B, OUTPUT_SIZE) and lang.shape == (B, NUM_LANG)
    assert jnp.allclose(sent, sent_ref, atol=1e-4, rtol=1e-4)
    assert jnp.allclose(lang, lang_ref, atol=1e-4, rtol=1e-4)

    print("KERNEL_OK")
</pallas_src>

<mosaic_0001>
module attributes {stable_mosaic.version = 11 : i64} {
  func.func @lisa_kernel(%arg0: memref<8x8x128xf32, #tpu.memory_space<vmem>>, %arg1: memref<8x128xi32, #tpu.memory_space<vmem>>, %arg2: memref<72x128xf32, #tpu.memory_space<vmem>>, %arg3: memref<8x128xf32, #tpu.memory_space<vmem>>) attributes {dimension_semantics = [], scalar_prefetch = 0 : i64, scratch_operands = 0 : i64, tpu.core_type = #tpu.core_type<tc>} {
    %c0 = arith.constant 0 : index
    %c0_0 = arith.constant 0 : index
    %0 = vector.load %arg2[%c0, %c0_0] : memref<72x128xf32, #tpu.memory_space<vmem>>, vector<32x128xf32>
    %c32 = arith.constant 32 : index
    %c0_1 = arith.constant 0 : index
    %1 = vector.load %arg2[%c32, %c0_1] : memref<72x128xf32, #tpu.memory_space<vmem>>, vector<32x128xf32>
    %c64 = arith.constant 64 : index
    %c0_2 = arith.constant 0 : index
    %2 = vector.load %arg2[%c64, %c0_2] : memref<72x128xf32, #tpu.memory_space<vmem>>, vector<1x128xf32>
    %c0_3 = arith.constant 0 : index
    %c0_4 = arith.constant 0 : index
    %3 = vector.load %arg1[%c0_3, %c0_4] : memref<8x128xi32, #tpu.memory_space<vmem>>, vector<8x32xi32>
    %cst = arith.constant 0.000000e+00 : f32
    %4 = vector.broadcast %cst : f32 to vector<8x32xf32>
    %cst_5 = arith.constant 0.000000e+00 : f32
    %5 = vector.broadcast %cst_5 : f32 to vector<8x32xf32>
    %c0_i32 = arith.constant 0 : i32
    %6 = arith.index_cast %c0_i32 : i32 to index
    %c0_6 = arith.constant 0 : index
    %c0_7 = arith.constant 0 : index
    %7 = vector.load %arg0[%6, %c0_6, %c0_7] : memref<8x8x128xf32, #tpu.memory_space<vmem>>, vector<1x8x128xf32>
    %8 = vector.shape_cast %7 : vector<1x8x128xf32> to vector<8x128xf32>
    %cst_8 = arith.constant dense<0.000000e+00> : vector<8x128xf32>
    %9 = tpu.matmul %4, %0, %cst_8 {dimension_numbers = #tpu.dot_dimension_numbers<[1], [0], [0], [1], [0, 0, 1, 1], [], []>} : vector<8x32xf32>, vector<32x128xf32>, vector<8x128xf32> -> vector<8x128xf32>
    %10 = arith.addf %8, %9 : vector<8x128xf32>
    %11 = arith.negf %10 : vector<8x128xf32>
    %12 = math.exp %11 : vector<8x128xf32>
    %cst_9 = arith.constant 1.000000e+00 : f32
    %13 = vector.broadcast %cst_9 : f32 to vector<8x128xf32>
    %14 = arith.addf %13, %12 : vector<8x128xf32>
    %15 = arith.divf %13, %14 : vector<8x128xf32>
    %16 = vector.extract_strided_slice %15 {offsets = [0, 0], sizes = [8, 32], strides = [1, 1]} : vector<8x128xf32> to vector<8x32xf32>
    %17 = vector.extract_strided_slice %15 {offsets = [0, 32], sizes = [8, 32], strides = [1, 1]} : vector<8x128xf32> to vector<8x32xf32>
    %18 = vector.extract_strided_slice %15 {offsets = [0, 64], sizes = [8, 32], strides = [1, 1]} : vector<8x128xf32> to vector<8x32xf32>
    %cst_10 = arith.constant 2.000000e+00 : f32
    %19 = vector.broadcast %cst_10 : f32 to vector<8x32xf32>
    %20 = arith.mulf %19, %18 : vector<8x32xf32>
    %cst_11 = arith.constant 1.000000e+00 : f32
    %21 = vector.broadcast %cst_11 : f32 to vector<8x32xf32>
    %22 = arith.subf %20, %21 : vector<8x32xf32>
    %23 = vector.extract_strided_slice %15 {offsets = [0, 96], sizes = [8, 32], strides = [1, 1]} : vector<8x128xf32> to vector<8x32xf32>
    %24 = arith.mulf %17, %5 : vector<8x32xf32>
    %25 = arith.mulf %16, %22 : vector<8x32xf32>
    %26 = arith.addf %24, %25 : vector<8x32xf32>
    %27 = math.tanh %26 : vector<8x32xf32>
    %28 = arith.mulf %23, %27 : vector<8x32xf32>
    %29 = vector.broadcast %c0_i32 : i32 to vector<8x32xi32>
    %30 = arith.cmpi slt, %29, %3 : vector<8x32xi32>
    %31 = arith.select %30, %28, %4 : vector<8x32xi1>, vector<8x32xf32>
    %32 = arith.select %30, %26, %5 : vector<8x32xi1>, vector<8x32xf32>
    %c1_i32 = arith.constant 1 : i32
    %33 = arith.index_cast %c1_i32 : i32 to index
    %c0_12 = arith.constant 0 : index
    %c0_13 = arith.constant 0 : index
    %34 = vector.load %arg0[%33, %c0_12, %c0_13] : memref<8x8x128xf32, #tpu.memory_space<vmem>>, vector<1x8x128xf32>
    %35 = vector.shape_cast %34 : vector<1x8x128xf32> to vector<8x128xf32>
    %cst_14 = arith.constant dense<0.000000e+00> : vector<8x128xf32>
    %36 = tpu.matmul %31, %0, %cst_14 {dimension_numbers = #tpu.dot_dimension_numbers<[1], [0], [0], [1], [0, 0, 1, 1], [], []>} : vector<8x32xf32>, vector<32x128xf32>, vector<8x128xf32> -> vector<8x128xf32>
    %37 = arith.addf %35, %36 : vector<8x128xf32>
    %38 = arith.negf %37 : vector<8x128xf32>
    %39 = math.exp %38 : vector<8x128xf32>
    %cst_15 = arith.constant 1.000000e+00 : f32
    %40 = vector.broadcast %cst_15 : f32 to vector<8x128xf32>
    %41 = arith.addf %40, %39 : vector<8x128xf32>
    %42 = arith.divf %40, %41 : vector<8x128xf32>
    %43 = vector.extract_strided_slice %42 {offsets = [0, 0], sizes = [8, 32], strides = [1, 1]} : vector<8x128xf32> to vector<8x32xf32>
    %44 = vector.extract_strided_slice %42 {offsets = [0, 32], sizes = [8, 32], strides = [1, 1]} : vector<8x128xf32> to vector<8x32xf32>
    %45 = vector.extract_strided_slice %42 {offsets = [0, 64], sizes = [8, 32], strides = [1, 1]} : vector<8x128xf32> to vector<8x32xf32>
    %cst_16 = arith.constant 2.000000e+00 : f32
    %46 = vector.broadcast %cst_16 : f32 to vector<8x32xf32>
    %47 = arith.mulf %46, %45 : vector<8x32xf32>
    %cst_17 = arith.constant 1.000000e+00 : f32
    %48 = vector.broadcast %cst_17 : f32 to vector<8x32xf32>
    %49 = arith.subf %47, %48 : vector<8x32xf32>
    %50 = vector.extract_strided_slice %42 {offsets = [0, 96], sizes = [8, 32], strides = [1, 1]} : vector<8x128xf32> to vector<8x32xf32>
    %51 = arith.mulf %44, %32 : vector<8x32xf32>
    %52 = arith.mulf %43, %49 : vector<8x32xf32>
    %53 = arith.addf %51, %52 : vector<8x32xf32>
    %54 = math.tanh %53 : vector<8x32xf32>
    %55 = arith.mulf %50, %54 : vector<8x32xf32>
    %56 = vector.broadcast %c1_i32 : i32 to vector<8x32xi32>
    %57 = arith.cmpi slt, %56, %3 : vector<8x32xi32>
    %58 = arith.select %57, %55, %31 : vector<8x32xi1>, vector<8x32xf32>
    %59 = arith.select %57, %53, %32 : vector<8x32xi1>, vector<8x32xf32>
    %c2_i32 = arith.constant 2 : i32
    %60 = arith.index_cast %c2_i32 : i32 to index
    %c0_18 = arith.constant 0 : index
    %c0_19 = arith.constant 0 : index
    %61 = vector.load %arg0[%60, %c0_18, %c0_19] : memref<8x8x128xf32, #tpu.memory_space<vmem>>, vector<1x8x128xf32>
    %62 = vector.shape_cast %61 : vector<1x8x128xf32> to vector<8x128xf32>
    %cst_20 = arith.constant dense<0.000000e+00> : vector<8x128xf32>
    %63 = tpu.matmul %58, %0, %cst_20 {dimension_numbers = #tpu.dot_dimension_numbers<[1], [0], [0], [1], [0, 0, 1, 1], [], []>} : vector<8x32xf32>, vector<32x128xf32>, vector<8x128xf32> -> vector<8x128xf32>
    %64 = arith.addf %62, %63 : vector<8x128xf32>
    %65 = arith.negf %64 : vector<8x128xf32>
    %66 = math.exp %65 : vector<8x128xf32>
    %cst_21 = arith.constant 1.000000e+00 : f32
    %67 = vector.broadcast %cst_21 : f32 to vector<8x128xf32>
    %68 = arith.addf %67, %66 : vector<8x128xf32>
    %69 = arith.divf %67, %68 : vector<8x128xf32>
    %70 = vector.extract_strided_slice %69 {offsets = [0, 0], sizes = [8, 32], strides = [1, 1]} : vector<8x128xf32> to vector<8x32xf32>
    %71 = vector.extract_strided_slice %69 {offsets = [0, 32], sizes = [8, 32], strides = [1, 1]} : vector<8x128xf32> to vector<8x32xf32>
    %72 = vector.extract_strided_slice %69 {offsets = [0, 64], sizes = [8, 32], strides = [1, 1]} : vector<8x128xf32> to vector<8x32xf32>
    %cst_22 = arith.constant 2.000000e+00 : f32
    %73 = vector.broadcast %cst_22 : f32 to vector<8x32xf32>
    %74 = arith.mulf %73, %72 : vector<8x32xf32>
    %cst_23 = arith.constant 1.000000e+00 : f32
    %75 = vector.broadcast %cst_23 : f32 to vector<8x32xf32>
    %76 = arith.subf %74, %75 : vector<8x32xf32>
    %77 = vector.extract_strided_slice %69 {offsets = [0, 96], sizes = [8, 32], strides = [1, 1]} : vector<8x128xf32> to vector<8x32xf32>
    %78 = arith.mulf %71, %59 : vector<8x32xf32>
    %79 = arith.mulf %70, %76 : vector<8x32xf32>
    %80 = arith.addf %78, %79 : vector<8x32xf32>
    %81 = math.tanh %80 : vector<8x32xf32>
    %82 = arith.mulf %77, %81 : vector<8x32xf32>
    %83 = vector.broadcast %c2_i32 : i32 to vector<8x32xi32>
    %84 = arith.cmpi slt, %83, %3 : vector<8x32xi32>
    %85 = arith.select %84, %82, %58 : vector<8x32xi1>, vector<8x32xf32>
    %86 = arith.select %84, %80, %59 : vector<8x32xi1>, vector<8x32xf32>
    %c3_i32 = arith.constant 3 : i32
    %87 = arith.index_cast %c3_i32 : i32 to index
    %c0_24 = arith.constant 0 : index
    %c0_25 = arith.constant 0 : index
    %88 = vector.load %arg0[%87, %c0_24, %c0_25] : memref<8x8x128xf32, #tpu.memory_space<vmem>>, vector<1x8x128xf32>
    %89 = vector.shape_cast %88 : vector<1x8x128xf32> to vector<8x128xf32>
    %cst_26 = arith.constant dense<0.000000e+00> : vector<8x128xf32>
    %90 = tpu.matmul %85, %0, %cst_26 {dimension_numbers = #tpu.dot_dimension_numbers<[1], [0], [0], [1], [0, 0, 1, 1], [], []>} : vector<8x32xf32>, vector<32x128xf32>, vector<8x128xf32> -> vector<8x128xf32>
    %91 = arith.addf %89, %90 : vector<8x128xf32>
    %92 = arith.negf %91 : vector<8x128xf32>
    %93 = math.exp %92 : vector<8x128xf32>
    %cst_27 = arith.constant 1.000000e+00 : f32
    %94 = vector.broadcast %cst_27 : f32 to vector<8x128xf32>
    %95 = arith.addf %94, %93 : vector<8x128xf32>
    %96 = arith.divf %94, %95 : vector<8x128xf32>
    %97 = vector.extract_strided_slice %96 {offsets = [0, 0], sizes = [8, 32], strides = [1, 1]} : vector<8x128xf32> to vector<8x32xf32>
    %98 = vector.extract_strided_slice %96 {offsets = [0, 32], sizes = [8, 32], strides = [1, 1]} : vector<8x128xf32> to vector<8x32xf32>
    %99 = vector.extract_strided_slice %96 {offsets = [0, 64], sizes = [8, 32], strides = [1, 1]} : vector<8x128xf32> to vector<8x32xf32>
    %cst_28 = arith.constant 2.000000e+00 : f32
    %100 = vector.broadcast %cst_28 : f32 to vector<8x32xf32>
    %101 = arith.mulf %100, %99 : vector<8x32xf32>
    %cst_29 = arith.constant 1.000000e+00 : f32
    %102 = vector.broadcast %cst_29 : f32 to vector<8x32xf32>
    %103 = arith.subf %101, %102 : vector<8x32xf32>
    %104 = vector.extract_strided_slice %96 {offsets = [0, 96], sizes = [8, 32], strides = [1, 1]} : vector<8x128xf32> to vector<8x32xf32>
    %105 = arith.mulf %98, %86 : vector<8x32xf32>
    %106 = arith.mulf %97, %103 : vector<8x32xf32>
    %107 = arith.addf %105, %106 : vector<8x32xf32>
    %108 = math.tanh %107 : vector<8x32xf32>
    %109 = arith.mulf %104, %108 : vector<8x32xf32>
    %110 = vector.broadcast %c3_i32 : i32 to vector<8x32xi32>
    %111 = arith.cmpi slt, %110, %3 : vector<8x32xi32>
    %112 = arith.select %111, %109, %85 : vector<8x32xi1>, vector<8x32xf32>
    %113 = arith.select %111, %107, %86 : vector<8x32xi1>, vector<8x32xf32>
    %c4_i32 = arith.constant 4 : i32
    %114 = arith.index_cast %c4_i32 : i32 to index
    %c0_30 = arith.constant 0 : index
    %c0_31 = arith.constant 0 : index
    %115 = vector.load %arg0[%114, %c0_30, %c0_31] : memref<8x8x128xf32, #tpu.memory_space<vmem>>, vector<1x8x128xf32>
    %116 = vector.shape_cast %115 : vector<1x8x128xf32> to vector<8x128xf32>
    %cst_32 = arith.constant dense<0.000000e+00> : vector<8x128xf32>
    %117 = tpu.matmul %112, %0, %cst_32 {dimension_numbers = #tpu.dot_dimension_numbers<[1], [0], [0], [1], [0, 0, 1, 1], [], []>} : vector<8x32xf32>, vector<32x128xf32>, vector<8x128xf32> -> vector<8x128xf32>
    %118 = arith.addf %116, %117 : vector<8x128xf32>
    %119 = arith.negf %118 : vector<8x128xf32>
    %120 = math.exp %119 : vector<8x128xf32>
    %cst_33 = arith.constant 1.000000e+00 : f32
    %121 = vector.broadcast %cst_33 : f32 to vector<8x128xf32>
    %122 = arith.addf %121, %120 : vector<8x128xf32>
    %123 = arith.divf %121, %122 : vector<8x128xf32>
    %124 = vector.extract_strided_slice %123 {offsets = [0, 0], sizes = [8, 32], strides = [1, 1]} : vector<8x128xf32> to vector<8x32xf32>
    %125 = vector.extract_strided_slice %123 {offsets = [0, 32], sizes = [8, 32], strides = [1, 1]} : vector<8x128xf32> to vector<8x32xf32>
    %126 = vector.extract_strided_slice %123 {offsets = [0, 64], sizes = [8, 32], strides = [1, 1]} : vector<8x128xf32> to vector<8x32xf32>
    %cst_34 = arith.constant 2.000000e+00 : f32
    %127 = vector.broadcast %cst_34 : f32 to vector<8x32xf32>
    %128 = arith.mulf %127, %126 : vector<8x32xf32>
    %cst_35 = arith.constant 1.000000e+00 : f32
    %129 = vector.broadcast %cst_35 : f32 to vector<8x32xf32>
    %130 = arith.subf %128, %129 : vector<8x32xf32>
    %131 = vector.extract_strided_slice %123 {offsets = [0, 96], sizes = [8, 32], strides = [1, 1]} : vector<8x128xf32> to vector<8x32xf32>
    %132 = arith.mulf %125, %113 : vector<8x32xf32>
    %133 = arith.mulf %124, %130 : vector<8x32xf32>
    %134 = arith.addf %132, %133 : vector<8x32xf32>
    %135 = math.tanh %134 : vector<8x32xf32>
    %136 = arith.mulf %131, %135 : vector<8x32xf32>
    %137 = vector.broadcast %c4_i32 : i32 to vector<8x32xi32>
    %138 = arith.cmpi slt, %137, %3 : vector<8x32xi32>
    %139 = arith.select %138, %136, %112 : vector<8x32xi1>, vector<8x32xf32>
    %140 = arith.select %138, %134, %113 : vector<8x32xi1>, vector<8x32xf32>
    %c5_i32 = arith.constant 5 : i32
    %141 = arith.index_cast %c5_i32 : i32 to index
    %c0_36 = arith.constant 0 : index
    %c0_37 = arith.constant 0 : index
    %142 = vector.load %arg0[%141, %c0_36, %c0_37] : memref<8x8x128xf32, #tpu.memory_space<vmem>>, vector<1x8x128xf32>
    %143 = vector.shape_cast %142 : vector<1x8x128xf32> to vector<8x128xf32>
    %cst_38 = arith.constant dense<0.000000e+00> : vector<8x128xf32>
    %144 = tpu.matmul %139, %0, %cst_38 {dimension_numbers = #tpu.dot_dimension_numbers<[1], [0], [0], [1], [0, 0, 1, 1], [], []>} : vector<8x32xf32>, vector<32x128xf32>, vector<8x128xf32> -> vector<8x128xf32>
    %145 = arith.addf %143, %144 : vector<8x128xf32>
    %146 = arith.negf %145 : vector<8x128xf32>
    %147 = math.exp %146 : vector<8x128xf32>
    %cst_39 = arith.constant 1.000000e+00 : f32
    %148 = vector.broadcast %cst_39 : f32 to vector<8x128xf32>
    %149 = arith.addf %148, %147 : vector<8x128xf32>
    %150 = arith.divf %148, %149 : vector<8x128xf32>
    %151 = vector.extract_strided_slice %150 {offsets = [0, 0], sizes = [8, 32], strides = [1, 1]} : vector<8x128xf32> to vector<8x32xf32>
    %152 = vector.extract_strided_slice %150 {offsets = [0, 32], sizes = [8, 32], strides = [1, 1]} : vector<8x128xf32> to vector<8x32xf32>
    %153 = vector.extract_strided_slice %150 {offsets = [0, 64], sizes = [8, 32], strides = [1, 1]} : vector<8x128xf32> to vector<8x32xf32>
    %cst_40 = arith.constant 2.000000e+00 : f32
    %154 = vector.broadcast %cst_40 : f32 to vector<8x32xf32>
    %155 = arith.mulf %154, %153 : vector<8x32xf32>
    %cst_41 = arith.constant 1.000000e+00 : f32
    %156 = vector.broadcast %cst_41 : f32 to vector<8x32xf32>
    %157 = arith.subf %155, %156 : vector<8x32xf32>
    %158 = vector.extract_strided_slice %150 {offsets = [0, 96], sizes = [8, 32], strides = [1, 1]} : vector<8x128xf32> to vector<8x32xf32>
    %159 = arith.mulf %152, %140 : vector<8x32xf32>
    %160 = arith.mulf %151, %157 : vector<8x32xf32>
    %161 = arith.addf %159, %160 : vector<8x32xf32>
    %162 = math.tanh %161 : vector<8x32xf32>
    %163 = arith.mulf %158, %162 : vector<8x32xf32>
    %164 = vector.broadcast %c5_i32 : i32 to vector<8x32xi32>
    %165 = arith.cmpi slt, %164, %3 : vector<8x32xi32>
    %166 = arith.select %165, %163, %139 : vector<8x32xi1>, vector<8x32xf32>
    %167 = arith.select %165, %161, %140 : vector<8x32xi1>, vector<8x32xf32>
    %c6_i32 = arith.constant 6 : i32
    %168 = arith.index_cast %c6_i32 : i32 to index
    %c0_42 = arith.constant 0 : index
    %c0_43 = arith.constant 0 : index
    %169 = vector.load %arg0[%168, %c0_42, %c0_43] : memref<8x8x128xf32, #tpu.memory_space<vmem>>, vector<1x8x128xf32>
    %170 = vector.shape_cast %169 : vector<1x8x128xf32> to vector<8x128xf32>
    %cst_44 = arith.constant dense<0.000000e+00> : vector<8x128xf32>
    %171 = tpu.matmul %166, %0, %cst_44 {dimension_numbers = #tpu.dot_dimension_numbers<[1], [0], [0], [1], [0, 0, 1, 1], [], []>} : vector<8x32xf32>, vector<32x128xf32>, vector<8x128xf32> -> vector<8x128xf32>
    %172 = arith.addf %170, %171 : vector<8x128xf32>
    %173 = arith.negf %172 : vector<8x128xf32>
    %174 = math.exp %173 : vector<8x128xf32>
    %cst_45 = arith.constant 1.000000e+00 : f32
    %175 = vector.broadcast %cst_45 : f32 to vector<8x128xf32>
    %176 = arith.addf %175, %174 : vector<8x128xf32>
    %177 = arith.divf %175, %176 : vector<8x128xf32>
    %178 = vector.extract_strided_slice %177 {offsets = [0, 0], sizes = [8, 32], strides = [1, 1]} : vector<8x128xf32> to vector<8x32xf32>
    %179 = vector.extract_strided_slice %177 {offsets = [0, 32], sizes = [8, 32], strides = [1, 1]} : vector<8x128xf32> to vector<8x32xf32>
    %180 = vector.extract_strided_slice %177 {offsets = [0, 64], sizes = [8, 32], strides = [1, 1]} : vector<8x128xf32> to vector<8x32xf32>
    %cst_46 = arith.constant 2.000000e+00 : f32
    %181 = vector.broadcast %cst_46 : f32 to vector<8x32xf32>
    %182 = arith.mulf %181, %180 : vector<8x32xf32>
    %cst_47 = arith.constant 1.000000e+00 : f32
    %183 = vector.broadcast %cst_47 : f32 to vector<8x32xf32>
    %184 = arith.subf %182, %183 : vector<8x32xf32>
    %185 = vector.extract_strided_slice %177 {offsets = [0, 96], sizes = [8, 32], strides = [1, 1]} : vector<8x128xf32> to vector<8x32xf32>
    %186 = arith.mulf %179, %167 : vector<8x32xf32>
    %187 = arith.mulf %178, %184 : vector<8x32xf32>
    %188 = arith.addf %186, %187 : vector<8x32xf32>
    %189 = math.tanh %188 : vector<8x32xf32>
    %190 = arith.mulf %185, %189 : vector<8x32xf32>
    %191 = vector.broadcast %c6_i32 : i32 to vector<8x32xi32>
    %192 = arith.cmpi slt, %191, %3 : vector<8x32xi32>
    %193 = arith.select %192, %190, %166 : vector<8x32xi1>, vector<8x32xf32>
    %194 = arith.select %192, %188, %167 : vector<8x32xi1>, vector<8x32xf32>
    %c7_i32 = arith.constant 7 : i32
    %195 = arith.index_cast %c7_i32 : i32 to index
    %c0_48 = arith.constant 0 : index
    %c0_49 = arith.constant 0 : index
    %196 = vector.load %arg0[%195, %c0_48, %c0_49] : memref<8x8x128xf32, #tpu.memory_space<vmem>>, vector<1x8x128xf32>
    %197 = vector.shape_cast %196 : vector<1x8x128xf32> to vector<8x128xf32>
    %cst_50 = arith.constant dense<0.000000e+00> : vector<8x128xf32>
    %198 = tpu.matmul %193, %0, %cst_50 {dimension_numbers = #tpu.dot_dimension_numbers<[1], [0], [0], [1], [0, 0, 1, 1], [], []>} : vector<8x32xf32>, vector<32x128xf32>, vector<8x128xf32> -> vector<8x128xf32>
    %199 = arith.addf %197, %198 : vector<8x128xf32>
    %200 = arith.negf %199 : vector<8x128xf32>
    %201 = math.exp %200 : vector<8x128xf32>
    %cst_51 = arith.constant 1.000000e+00 : f32
    %202 = vector.broadcast %cst_51 : f32 to vector<8x128xf32>
    %203 = arith.addf %202, %201 : vector<8x128xf32>
    %204 = arith.divf %202, %203 : vector<8x128xf32>
    %205 = vector.extract_strided_slice %204 {offsets = [0, 0], sizes = [8, 32], strides = [1, 1]} : vector<8x128xf32> to vector<8x32xf32>
    %206 = vector.extract_strided_slice %204 {offsets = [0, 32], sizes = [8, 32], strides = [1, 1]} : vector<8x128xf32> to vector<8x32xf32>
    %207 = vector.extract_strided_slice %204 {offsets = [0, 64], sizes = [8, 32], strides = [1, 1]} : vector<8x128xf32> to vector<8x32xf32>
    %cst_52 = arith.constant 2.000000e+00 : f32
    %208 = vector.broadcast %cst_52 : f32 to vector<8x32xf32>
    %209 = arith.mulf %208, %207 : vector<8x32xf32>
    %cst_53 = arith.constant 1.000000e+00 : f32
    %210 = vector.broadcast %cst_53 : f32 to vector<8x32xf32>
    %211 = arith.subf %209, %210 : vector<8x32xf32>
    %212 = vector.extract_strided_slice %204 {offsets = [0, 96], sizes = [8, 32], strides = [1, 1]} : vector<8x128xf32> to vector<8x32xf32>
    %213 = arith.mulf %206, %194 : vector<8x32xf32>
    %214 = arith.mulf %205, %211 : vector<8x32xf32>
    %215 = arith.addf %213, %214 : vector<8x32xf32>
    %216 = math.tanh %215 : vector<8x32xf32>
    %217 = arith.mulf %212, %216 : vector<8x32xf32>
    %218 = vector.broadcast %c7_i32 : i32 to vector<8x32xi32>
    %219 = arith.cmpi slt, %218, %3 : vector<8x32xi32>
    %220 = arith.select %219, %217, %193 : vector<8x32xi1>, vector<8x32xf32>
    %221 = arith.select %219, %215, %194 : vector<8x32xi1>, vector<8x32xf32>
    %c8_i32 = arith.constant 8 : i32
    %cst_54 = arith.constant dense<0.000000e+00> : vector<8x128xf32>
    %222 = tpu.matmul %220, %1, %cst_54 {dimension_numbers = #tpu.dot_dimension_numbers<[1], [0], [0], [1], [0, 0, 1, 1], [], []>} : vector<8x32xf32>, vector<32x128xf32>, vector<8x128xf32> -> vector<8x128xf32>
    %223 = vector.broadcast %2 : vector<1x128xf32> to vector<8x128xf32>
    %224 = arith.addf %222, %223 : vector<8x128xf32>
    %c0_55 = arith.constant 0 : index
    %c0_56 = arith.constant 0 : index
    %225 = vector.load %arg3[%c0_55, %c0_56] : memref<8x128xf32, #tpu.memory_space<vmem>>, vector<8x128xf32>
    tpu.vector_store %arg3[%c0_55, %c0_56], %224 {strides = array<i32>} : memref<8x128xf32, #tpu.memory_space<vmem>>, vector<8x128xf32>,
    return
  }
}

</mosaic_0001>

<bundles_post_ra>
// kernel: lisa_forward.1
= control target key start
LH: loop header
LB: loop body
LE: loop exit
PB: predicated region body
PF: predicated region fallthrough
CT: control target
= control target key end

     0   :  { %v1309_v0 = vmov 0.0|0.0   ;;  %vm1310_vm0 = vmmov 0   ;;  %v1311_v4 = vmov 0.0   ;;  %s1312_s22 = smov 64   ;;  %s1313_s23 = smov 32   ;;  %vm25_vm2 = vcmask 261120   ;;  %s1513_s2 = inlined_call_operand.vmem [shape: f32[72,128], index: 2, kind: input, shape index: {}]   ;;  %s1514_s0 = inlined_call_operand.vmem [shape: f32[8,8,128], index: 0, kind: input, shape index: {}]   ;;  %s1515_s1 = inlined_call_operand.vmem [shape: s32[8,128], index: 1, kind: input, shape index: {}]   ;;  %s1516_s3 = inlined_call_operand.vmem [shape: f32[8,128], index: 3, kind: output, shape index: {}]  }
   0x1   :  { %1201 = vmatprep.subr.bf16.mxu0 %v1309_v0  ;;  %v14_v1 = vld [vmem:[%s1513_s2] sm:$0xff]  ;;  %v15_v2 = vld [vmem:[%s1513_s2 + $0x8] sm:$0xff]  ;;  %v16_v3 = vld [vmem:[%s1513_s2 + $0x10] sm:$0xff]  ;;  %1110 = vmatprep.mubr.msk.f32.mxu0 %vm1310_vm0, %v1311_v4  ;;  %s1314_s24 = smov 96  }
   0x2   :  { %v1347_v5 = vpack.c.bf16 %v15_v2, %v14_v1  ;;  %v17_v6 = vld [vmem:[%s1513_s2 + $0x18] sm:$0xff]  ;;  %1207 = vmatprep.subr.bf16.mxu1 %v1309_v0  ;;  %1121 = vmatprep.mubr.msk.f32.mxu1 %vm1310_vm0, %v1311_v4  ;;  %v24_v8 = vld [vmem:[%s1514_s0] sm:$0xff]  ;;  %v1027_v31 = vld [vmem:[%s1514_s0 + $0x8] sm:$0xff] }
   0x3   :  { %v1356_v7 = vpack.c.bf16 %v17_v6, %v16_v3  ;;  %v1382_v24 = vld [vmem:[%s1515_s1] sm:$0xff]  ;;  %v1031_v54 = vld [vmem:[%s1514_s0 + $0x10] sm:$0xff] }
   0x4   :  { %1203 = vmatpush3.bf16.msra.mxu0 %v1347_v5  ;;  %1209 = vmatpush3.bf16.msra.mxu1 %v1347_v5  ;;  %vm125_vm1 = vcmp.gt.s32.totalorder %v1382_v24, 0  ;;  %vm241_vm3 = vcmp.gt.s32.totalorder %v1382_v24, 1  ;;  %vm357_vm4 = vcmp.gt.s32.totalorder %v1382_v24, 2  ;;  %vm473_vm5 = vcmp.gt.s32.totalorder %v1382_v24, 3 }
   0x5   :  { %1204 = vmatprep.subr.bf16.mxu0 %v1309_v0  ;;  %1210 = vmatprep.subr.bf16.mxu1 %v1309_v0  ;;  %vm589_vm6 = vcmp.gt.s32.totalorder %v1382_v24, 4  ;;  %vm705_vm7 = vcmp.gt.s32.totalorder %v1382_v24, 5  ;;  %vm821_vm8 = vcmp.gt.s32.totalorder %v1382_v24, 6  ;;  %vm937_vm9 = vcmp.gt.s32.totalorder %v1382_v24, 7 }
   0x8   :  { %1206 = vmatpush3.bf16.msra.mxu0 %v1356_v7  ;;  %1212 = vmatpush3.bf16.msra.mxu1 %v1356_v7 }
   0x9   :  { %1213 = vmatprep.subr.bf16.mxu0 %v1309_v0  ;;  %1219 = vmatprep.subr.bf16.mxu1 %v1309_v0 }
   0xb   :  { %1111 = vmatmul.mubr.f32.vlgmr.msra.gmra.mrb[0].mxu0 %v1311_v4 }
   0xc   :  { %1215 = vmatpush3.bf16.msra.mxu0 %v1347_v5  ;;  %1132 = vmatprep.mubr.msk.f32.mxu0 %vm1310_vm0, %v1311_v4 }
   0xd   :  { %1216 = vmatprep.subr.bf16.mxu0 %v1309_v0 }
  0x10   :  { %1218 = vmatpush3.bf16.msra.mxu0 %v1356_v7 }
  0x11   :  { %1225 = vmatprep.subr.bf16.mxu0 %v1309_v0 }
  0xde   :  { %v95_v9 = vpop.f32.mrb[0].mxu0 }
  0xdf   :  { %v99_v10 = vadd.f32 %v95_v9, %v24_v8  ;;  %v1112_v11 = vpop.f32.mrb[1].mxu0 }
  0xe1   :  { %v1025_v12 = vmul.f32 -1.442695, %v99_v10 }
  0xe3   :  { %1261 = vpow2.f32 %v1025_v12 }
  0xed   :  { %v1262_v13 = vpop.eup %1261 }
  0xee   :  { %v103_v14 = vadd.f32 1.0, %v1262_v13 }
  0xf0   :  { %1263 = vrcp.f32 %v103_v14 }
  0xfa   :  { %v1264_v15 = vpop.eup %1263 }
  0xfb   :  { %v106_v16 = vmul.f32 2.0, %v1264_v15  ;;  %v108_v20 = vmul.f32 0.0, %v1264_v15 }
  0xfd   :  { %v1026_v17 = vadd.f32 -1.0, %v106_v16 }
  0xff   :  { %110 = vrot.lane.b32.xlu0 %v1026_v17, %s1312_s22  ;;  %v1035_v17 = vld [vmem:[%s1514_s0 + $0x18] sm:$0xff] }
 0x171   :  { %v111_v18 = vpop.permute.xlu0 %110 }
 0x172   :  { %v113_v19 = vmul.f32 %v1264_v15, %v111_v18 }
 0x174   :  { %115 = vrot.lane.b32.xlu0 %v113_v19, %s1313_s23 }
 0x1e6   :  { %v116_v21 = vpop.permute.xlu0 %115 }
 0x1e7   :  { %v118_v22 = vadd.f32 %v116_v21, %v108_v20 }
 0x1e9   :  { %1265 = vtanh.f32 %v118_v22  ;;  %132 = vrot.lane.b32.xlu0 %v118_v22, %s1314_s24 }
 0x1f3   :  { %v1266_v23 = vpop.eup %1265 }
 0x1f4   :  { %121 = vrot.lane.b32.xlu1 %v1266_v23, %s1312_s22 }
 0x25b   :  { %v133_v25 = vpop.permute.xlu0 %132 }
 0x25c   :  { %v135_v26 = vsel %vm125_vm1, %v133_v25, 0.0 }
 0x25d   :  { %221 = vrot.lane.b32.xlu0 %v135_v26, %s1313_s23 }
 0x266   :  { %v122_v27 = vpop.permute.xlu1 %121 }
 0x267   :  { %v124_v28 = vmul.f32 %v1264_v15, %v122_v27 }
 0x269   :  { %127 = vrot.lane.b32.xlu1 %v124_v28, %s1313_s23 }
 0x2cf   :  { %v222_v43 = vpop.permute.xlu0 %221 }
 0x2db   :  { %v128_v29 = vpop.permute.xlu1 %127 }
 0x2dc   :  { %v130_v30 = vsel %vm125_vm1, %v128_v29, 0.0 }
 0x2dd   :  { %1122 = vmatmul.mubr.msk.f32.vlgmr.msra.gmra.mrb[0].mxu1 %vm25_vm2, %v130_v30 }
 0x2de   :  { %1221 = vmatpush3.bf16.msra.mxu1 %v1347_v5  ;;  %1143 = vmatprep.mubr.msk.f32.mxu1 %vm1310_vm0, %v1311_v4 }
 0x2df   :  { %1222 = vmatprep.subr.bf16.mxu1 %v1309_v0 }
 0x2e2   :  { %1224 = vmatpush3.bf16.msra.mxu1 %v1356_v7 }
 0x2e3   :  { %1231 = vmatprep.subr.bf16.mxu1 %v1309_v0 }
 0x3b0   :  { %v207_v32 = vpop.f32.mrb[0].mxu1 }
 0x3b1   :  { %v211_v33 = vadd.f32 %v1027_v31, %v207_v32  ;;  %v1123_v34 = vpop.f32.mrb[1].mxu1 }
 0x3b3   :  { %v1029_v35 = vmul.f32 -1.442695, %v211_v33 }
 0x3b5   :  { %1267 = vpow2.f32 %v1029_v35 }
 0x3bf   :  { %v1268_v36 = vpop.eup %1267 }
 0x3c0   :  { %v215_v37 = vadd.f32 1.0, %v1268_v36 }
 0x3c2   :  { %1269 = vrcp.f32 %v215_v37 }
 0x3cc   :  { %v1270_v38 = vpop.eup %1269 }
 0x3cd   :  { %v218_v39 = vmul.f32 2.0, %v1270_v38  ;;  %v224_v44 = vmul.f32 %v1270_v38, %v222_v43 }
 0x3cf   :  { %v1030_v40 = vadd.f32 -1.0, %v218_v39 }
 0x3d1   :  { %226 = vrot.lane.b32.xlu1 %v1030_v40, %s1312_s22 }
 0x443   :  { %v227_v41 = vpop.permute.xlu1 %226 }
 0x444   :  { %v229_v42 = vmul.f32 %v1270_v38, %v227_v41  ;;  %v1039_v41 = vld [vmem:[%s1514_s0 + $0x20] sm:$0xff] }
 0x446   :  { %231 = vrot.lane.b32.xlu1 %v229_v42, %s1313_s23 }
 0x4b8   :  { %v232_v45 = vpop.permute.xlu1 %231 }
 0x4b9   :  { %v234_v46 = vadd.f32 %v232_v45, %v224_v44 }
 0x4bb   :  { %1271 = vtanh.f32 %v234_v46 }
 0x4c5   :  { %v1272_v47 = vpop.eup %1271 }
 0x4c6   :  { %237 = vrot.lane.b32.xlu0 %v1272_v47, %s1312_s22 }
 0x4ca   :  { %248 = vrot.lane.b32.xlu0 %v234_v46, %s1314_s24 }
 0x538   :  { %v238_v48 = vpop.permute.xlu0 %237 }
 0x539   :  { %v240_v49 = vmul.f32 %v1270_v38, %v238_v48 }
 0x53b   :  { %243 = vrot.lane.b32.xlu1 %v240_v49, %s1313_s23 }
 0x53c   :  { %v249_v50 = vpop.permute.xlu0 %248 }
 0x53d   :  { %v251_v51 = vsel %vm241_vm3, %v249_v50, %v135_v26 }
 0x53e   :  { %337 = vrot.lane.b32.xlu0 %v251_v51, %s1313_s23 }
 0x5ad   :  { %v244_v52 = vpop.permute.xlu1 %243 }
 0x5ae   :  { %v246_v53 = vsel %vm241_vm3, %v244_v52, %v130_v30 }
 0x5af   :  { %1133 = vmatmul.mubr.msk.f32.vlgmr.msra.gmra.mrb[2].mxu0 %vm25_vm2, %v246_v53 }
 0x5b0   :  { %1227 = vmatpush3.bf16.msra.mxu0 %v1347_v5  ;;  %1154 = vmatprep.mubr.msk.f32.mxu0 %vm1310_vm0, %v1311_v4  ;;  %v338_v3 = vpop.permute.xlu0 %337 }
 0x5b1   :  { %1228 = vmatprep.subr.bf16.mxu0 %v1309_v0 }
 0x5b4   :  { %1230 = vmatpush3.bf16.msra.mxu0 %v1356_v7 }
 0x5b5   :  { %1237 = vmatprep.subr.bf16.mxu0 %v1309_v0 }
 0x682   :  { %v323_v55 = vpop.f32.mrb[2].mxu0 }
 0x683   :  { %v327_v56 = vadd.f32 %v1031_v54, %v323_v55  ;;  %v1134_v57 = vpop.f32.mrb[3].mxu0 }
 0x685   :  { %v1033_v58 = vmul.f32 -1.442695, %v327_v56 }
 0x687   :  { %1273 = vpow2.f32 %v1033_v58 }
 0x691   :  { %v1274_v59 = vpop.eup %1273 }
 0x692   :  { %v331_v60 = vadd.f32 1.0, %v1274_v59 }
 0x694   :  { %1275 = vrcp.f32 %v331_v60 }
 0x69e   :  { %v1276_v61 = vpop.eup %1275 }
 0x69f   :  { %v334_v62 = vmul.f32 2.0, %v1276_v61  ;;  %v340_v6 = vmul.f32 %v1276_v61, %v338_v3 }
 0x6a1   :  { %v1034_v63 = vadd.f32 -1.0, %v334_v62 }
 0x6a3   :  { %342 = vrot.lane.b32.xlu1 %v1034_v63, %s1312_s22 }
 0x715   :  { %v343_v1 = vpop.permute.xlu1 %342 }
 0x716   :  { %v345_v2 = vmul.f32 %v1276_v61, %v343_v1  ;;  %v1043_v1 = vld [vmem:[%s1514_s0 + $0x28] sm:$0xff] }
 0x718   :  { %347 = vrot.lane.b32.xlu1 %v345_v2, %s1313_s23 }
 0x78a   :  { %v348_v8 = vpop.permute.xlu1 %347 }
 0x78b   :  { %v350_v9 = vadd.f32 %v348_v8, %v340_v6 }
 0x78d   :  { %1277 = vtanh.f32 %v350_v9 }
 0x797   :  { %v1278_v10 = vpop.eup %1277 }
 0x798   :  { %353 = vrot.lane.b32.xlu0 %v1278_v10, %s1312_s22 }
 0x79c   :  { %364 = vrot.lane.b32.xlu0 %v350_v9, %s1314_s24 }
 0x80a   :  { %v354_v11 = vpop.permute.xlu0 %353 }
 0x80b   :  { %v356_v12 = vmul.f32 %v1276_v61, %v354_v11 }
 0x80d   :  { %359 = vrot.lane.b32.xlu1 %v356_v12, %s1313_s23 }
 0x80e   :  { %v365_v13 = vpop.permute.xlu0 %364 }
 0x80f   :  { %v367_v14 = vsel %vm357_vm4, %v365_v13, %v251_v51 }
 0x810   :  { %453 = vrot.lane.b32.xlu0 %v367_v14, %s1313_s23 }
 0x87f   :  { %v360_v15 = vpop.permute.xlu1 %359 }
 0x880   :  { %v362_v16 = vsel %vm357_vm4, %v360_v15, %v246_v53 }
 0x881   :  { %1144 = vmatmul.mubr.msk.f32.vlgmr.msra.gmra.mrb[2].mxu1 %vm25_vm2, %v362_v16 }
 0x882   :  { %1233 = vmatpush3.bf16.msra.mxu1 %v1347_v5  ;;  %1165 = vmatprep.mubr.msk.f32.mxu1 %vm1310_vm0, %v1311_v4  ;;  %v454_v30 = vpop.permute.xlu0 %453 }
 0x883   :  { %1234 = vmatprep.subr.bf16.mxu1 %v1309_v0 }
 0x886   :  { %1236 = vmatpush3.bf16.msra.mxu1 %v1356_v7 }
 0x887   :  { %1243 = vmatprep.subr.bf16.mxu1 %v1309_v0 }
 0x954   :  { %v439_v18 = vpop.f32.mrb[2].mxu1 }
 0x955   :  { %v443_v19 = vadd.f32 %v1035_v17, %v439_v18  ;;  %v1145_v20 = vpop.f32.mrb[3].mxu1 }
 0x957   :  { %v1037_v21 = vmul.f32 -1.442695, %v443_v19 }
 0x959   :  { %1279 = vpow2.f32 %v1037_v21 }
 0x963   :  { %v1280_v22 = vpop.eup %1279 }
 0x964   :  { %v447_v23 = vadd.f32 1.0, %v1280_v22 }
 0x966   :  { %1281 = vrcp.f32 %v447_v23 }
 0x970   :  { %v1282_v25 = vpop.eup %1281 }
 0x971   :  { %v450_v26 = vmul.f32 2.0, %v1282_v25  ;;  %v456_v31 = vmul.f32 %v1282_v25, %v454_v30 }
 0x973   :  { %v1038_v27 = vadd.f32 -1.0, %v450_v26  ;;  %v1047_v26 = vld [vmem:[%s1514_s0 + $0x30] sm:$0xff] }
 0x975   :  { %458 = vrot.lane.b32.xlu1 %v1038_v27, %s1312_s22 }
 0x9e7   :  { %v459_v28 = vpop.permute.xlu1 %458 }
 0x9e8   :  { %v461_v29 = vmul.f32 %v1282_v25, %v459_v28 }
 0x9ea   :  { %463 = vrot.lane.b32.xlu1 %v461_v29, %s1313_s23 }
 0xa5c   :  { %v464_v32 = vpop.permute.xlu1 %463 }
 0xa5d   :  { %v466_v33 = vadd.f32 %v464_v32, %v456_v31 }
 0xa5f   :  { %1283 = vtanh.f32 %v466_v33 }
 0xa69   :  { %v1284_v34 = vpop.eup %1283 }
 0xa6a   :  { %469 = vrot.lane.b32.xlu0 %v1284_v34, %s1312_s22 }
 0xa6e   :  { %480 = vrot.lane.b32.xlu0 %v466_v33, %s1314_s24 }
 0xadc   :  { %v470_v35 = vpop.permute.xlu0 %469 }
 0xadd   :  { %v472_v36 = vmul.f32 %v1282_v25, %v470_v35 }
 0xadf   :  { %475 = vrot.lane.b32.xlu1 %v472_v36, %s1313_s23 }
 0xae0   :  { %v481_v37 = vpop.permute.xlu0 %480 }
 0xae1   :  { %v483_v38 = vsel %vm473_vm5, %v481_v37, %v367_v14 }
 0xae2   :  { %569 = vrot.lane.b32.xlu0 %v483_v38, %s1313_s23 }
 0xb51   :  { %v476_v39 = vpop.permute.xlu1 %475 }
 0xb52   :  { %v478_v40 = vsel %vm473_vm5, %v476_v39, %v362_v16 }
 0xb53   :  { %1155 = vmatmul.mubr.msk.f32.vlgmr.msra.gmra.mrb[4].mxu0 %vm25_vm2, %v478_v40 }
 0xb54   :  { %1239 = vmatpush3.bf16.msra.mxu0 %v1347_v5  ;;  %1176 = vmatprep.mubr.msk.f32.mxu0 %vm1310_vm0, %v1311_v4  ;;  %v570_v53 = vpop.permute.xlu0 %569 }
 0xb55   :  { %1240 = vmatprep.subr.bf16.mxu0 %v1309_v0 }
 0xb58   :  { %1242 = vmatpush3.bf16.msra.mxu0 %v1356_v7 }
 0xb59   :  { %1249 = vmatprep.subr.bf16.mxu0 %v1309_v0 }
 0xc26   :  { %v555_v42 = vpop.f32.mrb[4].mxu0 }
 0xc27   :  { %v559_v43 = vadd.f32 %v1039_v41, %v555_v42  ;;  %v1156_v44 = vpop.f32.mrb[5].mxu0 }
 0xc29   :  { %v1041_v45 = vmul.f32 -1.442695, %v559_v43 }
 0xc2b   :  { %1285 = vpow2.f32 %v1041_v45 }
 0xc35   :  { %v1286_v46 = vpop.eup %1285 }
 0xc36   :  { %v563_v47 = vadd.f32 1.0, %v1286_v46 }
 0xc38   :  { %1287 = vrcp.f32 %v563_v47 }
 0xc42   :  { %v1288_v48 = vpop.eup %1287 }
 0xc43   :  { %v566_v49 = vmul.f32 2.0, %v1288_v48  ;;  %v572_v54 = vmul.f32 %v1288_v48, %v570_v53 }
 0xc45   :  { %v1042_v50 = vadd.f32 -1.0, %v566_v49 }
 0xc47   :  { %574 = vrot.lane.b32.xlu1 %v1042_v50, %s1312_s22 }
 0xcb9   :  { %v575_v51 = vpop.permute.xlu1 %574 }
 0xcba   :  { %v577_v52 = vmul.f32 %v1288_v48, %v575_v51 }
 0xcbc   :  { %579 = vrot.lane.b32.xlu1 %v577_v52, %s1313_s23 }
 0xd2e   :  { %v580_v55 = vpop.permute.xlu1 %579 }
 0xd2f   :  { %v582_v56 = vadd.f32 %v580_v55, %v572_v54 }
 0xd31   :  { %1289 = vtanh.f32 %v582_v56 }
 0xd3b   :  { %v1290_v57 = vpop.eup %1289 }
 0xd3c   :  { %585 = vrot.lane.b32.xlu0 %v1290_v57, %s1312_s22 }
 0xd40   :  { %596 = vrot.lane.b32.xlu0 %v582_v56, %s1314_s24 }
 0xdae   :  { %v586_v58 = vpop.permute.xlu0 %585 }
 0xdaf   :  { %v588_v59 = vmul.f32 %v1288_v48, %v586_v58  ;;  %v1051_v48 = vld [vmem:[%s1514_s0 + $0x38] sm:$0xff] }
 0xdb1   :  { %591 = vrot.lane.b32.xlu1 %v588_v59, %s1313_s23 }
 0xdb2   :  { %v597_v60 = vpop.permute.xlu0 %596 }
 0xdb3   :  { %v599_v61 = vsel %vm589_vm6, %v597_v60, %v483_v38 }
 0xdb4   :  { %685 = vrot.lane.b32.xlu0 %v599_v61, %s1313_s23 }
 0xe23   :  { %v592_v62 = vpop.permute.xlu1 %591 }
 0xe24   :  { %v594_v63 = vsel %vm589_vm6, %v592_v62, %v478_v40 }
 0xe25   :  { %1166 = vmatmul.mubr.msk.f32.vlgmr.msra.gmra.mrb[4].mxu1 %vm25_vm2, %v594_v63 }
 0xe26   :  { %1245 = vmatpush3.bf16.msra.mxu1 %v1347_v5  ;;  %1187 = vmatprep.mubr.msk.f32.mxu1 %vm1310_vm0, %v1311_v4 }
 0xe27   :  { %1246 = vmatprep.subr.bf16.mxu1 %v1309_v0 }
 0xe2a   :  { %1248 = vmatpush3.bf16.msra.mxu1 %v1356_v7  ;;  %v686_v7 = vpop.permute.xlu0 %685 }
 0xef8   :  { %v671_v2 = vpop.f32.mrb[4].mxu1 }
 0xef9   :  { %v675_v3 = vadd.f32 %v1043_v1, %v671_v2  ;;  %v1167_v6 = vpop.f32.mrb[5].mxu1  ;;  %v18_v1 = vld [vmem:[%s1513_s2 + $0x20] sm:$0xff]  ;;  %v19_v2 = vld [vmem:[%s1513_s2 + $0x28] sm:$0xff] }
 0xefa   :  { %v1250_v6 = vpack.c.bf16 %v19_v2, %v18_v1 }
 0xefb   :  { %v1045_v8 = vmul.f32 -1.442695, %v675_v3  ;;  %v20_v3 = vld [vmem:[%s1513_s2 + $0x30] sm:$0xff] }
 0xefd   :  { %1291 = vpow2.f32 %v1045_v8  ;;  %v21_v8 = vld [vmem:[%s1513_s2 + $0x38] sm:$0xff] }
 0xf07   :  { %v1292_v9 = vpop.eup %1291 }
 0xf08   :  { %v679_v10 = vadd.f32 1.0, %v1292_v9  ;;  %v1253_v9 = vpack.c.bf16 %v21_v8, %v20_v3 }
 0xf0a   :  { %1293 = vrcp.f32 %v679_v10 }
 0xf14   :  { %v1294_v5 = vpop.eup %1293 }
 0xf15   :  { %v682_v11 = vmul.f32 2.0, %v1294_v5  ;;  %v688_v15 = vmul.f32 %v1294_v5, %v686_v7 }
 0xf17   :  { %v1046_v12 = vadd.f32 -1.0, %v682_v11 }
 0xf19   :  { %690 = vrot.lane.b32.xlu1 %v1046_v12, %s1312_s22 }
 0xf8b   :  { %v691_v13 = vpop.permute.xlu1 %690 }
 0xf8c   :  { %v693_v14 = vmul.f32 %v1294_v5, %v691_v13 }
 0xf8e   :  { %695 = vrot.lane.b32.xlu1 %v693_v14, %s1313_s23  ;;  %v1055_v14 = vld [vmem:[%s1513_s2 + $0x40] ss:$0 sm:$0xff] }
0x1000   :  { %v696_v16 = vpop.permute.xlu1 %695 }
0x1001   :  { %v698_v17 = vadd.f32 %v696_v16, %v688_v15 }
0x1003   :  { %1295 = vtanh.f32 %v698_v17 }
0x100d   :  { %v1296_v18 = vpop.eup %1295 }
0x100e   :  { %701 = vrot.lane.b32.xlu0 %v1296_v18, %s1312_s22 }
0x1012   :  { %712 = vrot.lane.b32.xlu0 %v698_v17, %s1314_s24 }
0x1080   :  { %v702_v19 = vpop.permute.xlu0 %701 }
0x1081   :  { %v704_v20 = vmul.f32 %v1294_v5, %v702_v19 }
0x1083   :  { %707 = vrot.lane.b32.xlu1 %v704_v20, %s1313_s23 }
0x1084   :  { %v713_v21 = vpop.permute.xlu0 %712 }
0x1085   :  { %v715_v22 = vsel %vm705_vm7, %v713_v21, %v599_v61 }
0x1086   :  { %801 = vrot.lane.b32.xlu0 %v715_v22, %s1313_s23 }
0x10f5   :  { %v708_v23 = vpop.permute.xlu1 %707 }
0x10f6   :  { %v710_v25 = vsel %vm705_vm7, %v708_v23, %v594_v63 }
0x10f7   :  { %1177 = vmatmul.mubr.msk.f32.vlgmr.msra.gmra.mrb[6].mxu0 %vm25_vm2, %v710_v25 }
0x10f8   :  { %1198 = vmatprep.mubr.msk.f32.mxu0 %vm1310_vm0, %v1311_v4  ;;  %v802_v4 = vpop.permute.xlu0 %801  ;;  %1251 = vmatpush3.bf16.msra.mxu0 %v1250_v6 }
0x10f9   :  { %1252 = vmatprep.subr.bf16.mxu0 %v1309_v0 }
0x10fc   :  { %1254 = vmatpush3.bf16.msra.mxu0 %v1253_v9 }
0x11ca   :  { %v787_v27 = vpop.f32.mrb[6].mxu0 }
0x11cb   :  { %v791_v28 = vadd.f32 %v1047_v26, %v787_v27  ;;  %v1178_v29 = vpop.f32.mrb[7].mxu0 }
0x11cd   :  { %v1049_v30 = vmul.f32 -1.442695, %v791_v28 }
0x11cf   :  { %1297 = vpow2.f32 %v1049_v30 }
0x11d9   :  { %v1298_v31 = vpop.eup %1297 }
0x11da   :  { %v795_v32 = vadd.f32 1.0, %v1298_v31 }
0x11dc   :  { %1299 = vrcp.f32 %v795_v32 }
0x11e6   :  { %v1300_v33 = vpop.eup %1299 }
0x11e7   :  { %v798_v34 = vmul.f32 2.0, %v1300_v33  ;;  %v804_v38 = vmul.f32 %v1300_v33, %v802_v4 }
0x11e9   :  { %v1050_v35 = vadd.f32 -1.0, %v798_v34 }
0x11eb   :  { %806 = vrot.lane.b32.xlu1 %v1050_v35, %s1312_s22 }
0x125d   :  { %v807_v36 = vpop.permute.xlu1 %806 }
0x125e   :  { %v809_v37 = vmul.f32 %v1300_v33, %v807_v36 }
0x1260   :  { %811 = vrot.lane.b32.xlu1 %v809_v37, %s1313_s23 }
0x12d2   :  { %v812_v39 = vpop.permute.xlu1 %811 }
0x12d3   :  { %v814_v40 = vadd.f32 %v812_v39, %v804_v38 }
0x12d5   :  { %1301 = vtanh.f32 %v814_v40 }
0x12df   :  { %v1302_v41 = vpop.eup %1301 }
0x12e0   :  { %817 = vrot.lane.b32.xlu0 %v1302_v41, %s1312_s22 }
0x12e4   :  { %828 = vrot.lane.b32.xlu0 %v814_v40, %s1314_s24 }
0x1352   :  { %v818_v42 = vpop.permute.xlu0 %817 }
0x1353   :  { %v820_v43 = vmul.f32 %v1300_v33, %v818_v42 }
0x1355   :  { %823 = vrot.lane.b32.xlu1 %v820_v43, %s1313_s23 }
0x1356   :  { %v829_v44 = vpop.permute.xlu0 %828 }
0x1357   :  { %v831_v45 = vsel %vm821_vm8, %v829_v44, %v715_v22 }
0x1358   :  { %917 = vrot.lane.b32.xlu0 %v831_v45, %s1313_s23 }
0x13c7   :  { %v824_v46 = vpop.permute.xlu1 %823 }
0x13c8   :  { %v826_v47 = vsel %vm821_vm8, %v824_v46, %v710_v25 }
0x13c9   :  { %1188 = vmatmul.mubr.msk.f32.vlgmr.msra.gmra.mrb[6].mxu1 %vm25_vm2, %v826_v47 }
0x13ca   :  { %v918_v60 = vpop.permute.xlu0 %917 }
0x149c   :  { %v903_v49 = vpop.f32.mrb[6].mxu1 }
0x149d   :  { %v907_v50 = vadd.f32 %v1051_v48, %v903_v49  ;;  %v1189_v51 = vpop.f32.mrb[7].mxu1 }
0x149f   :  { %v1053_v52 = vmul.f32 -1.442695, %v907_v50 }
0x14a1   :  { %1303 = vpow2.f32 %v1053_v52 }
0x14ab   :  { %v1304_v53 = vpop.eup %1303 }
0x14ac   :  { %v911_v54 = vadd.f32 1.0, %v1304_v53 }
0x14ae   :  { %1305 = vrcp.f32 %v911_v54 }
0x14b8   :  { %v1306_v55 = vpop.eup %1305 }
0x14b9   :  { %v914_v56 = vmul.f32 2.0, %v1306_v55  ;;  %v920_v61 = vmul.f32 %v1306_v55, %v918_v60 }
0x14bb   :  { %v1054_v57 = vadd.f32 -1.0, %v914_v56 }
0x14bd   :  { %922 = vrot.lane.b32.xlu1 %v1054_v57, %s1312_s22 }
0x152f   :  { %v923_v58 = vpop.permute.xlu1 %922 }
0x1530   :  { %v925_v59 = vmul.f32 %v1306_v55, %v923_v58 }
0x1532   :  { %927 = vrot.lane.b32.xlu1 %v925_v59, %s1313_s23 }
0x15a4   :  { %v928_v62 = vpop.permute.xlu1 %927 }
0x15a5   :  { %v930_v63 = vadd.f32 %v928_v62, %v920_v61 }
0x15a7   :  { %1307 = vtanh.f32 %v930_v63 }
0x15b1   :  { %v1308_v10 = vpop.eup %1307 }
0x15b2   :  { %933 = vrot.lane.b32.xlu0 %v1308_v10, %s1312_s22 }
0x1624   :  { %v934_v5 = vpop.permute.xlu0 %933 }
0x1625   :  { %v936_v11 = vmul.f32 %v1306_v55, %v934_v5 }
0x1627   :  { %939 = vrot.lane.b32.xlu1 %v936_v11, %s1313_s23 }
0x1699   :  { %v940_v12 = vpop.permute.xlu1 %939 }
0x169a   :  { %v942_v13 = vsel %vm937_vm9, %v940_v12, %v826_v47 }
0x169b   :  { %1199 = vmatmul.mubr.msk.f32.vlgmr.msra.gmra.mrb[8].mxu0 %vm25_vm2, %v942_v13 }
0x176e   :  { %v1016_v7 = vpop.f32.mrb[8].mxu0 }
0x176f   :  { %v1017_v0 = vadd.f32 %v1055_v14, %v1016_v7  ;;  %v1200_v15 = vpop.f32.mrb[9].mxu0 }
0x1771   :  { %1020 = vst [vmem:[%s1516_s3] sm:$0xff] %v1017_v0 }

</bundles_post_ra>
